<compile_context>
chip_gen: v6e
topology: v6e:2x2x1
jax: 0.10.0
libtpu: 0.0.40
codegen_flags: <defaults>
</compile_context>

<pallas_src>
import math

import jax
import jax.numpy as jnp
from jax import lax
from jax.experimental import pallas as pl
from jax.experimental.pallas import tpu as pltpu

EPS = 1e-5
MATMUL_DTYPE = jnp.bfloat16   # MXU operands & resident activations; accumulation is f32.
TN_TARGET = 512               # target output-feature tile width (multiple of 128 and 256)


def _round_up(n, m):
    return ((n + m - 1) // m) * m


def _pad2d(a, rows, cols):
    r, c = a.shape
    return jnp.pad(a, ((0, rows - r), (0, cols - c)))


def _tpu_vmem_and_align():
    """Generation-aware (physical VMEM bytes, lane/contraction alignment)."""
    vmem_cap = 64 * 1024 * 1024            # conservative default (v7x: 64 MiB per TC)
    align = 256                            # v6e/v7x MXU is 2x256x256
    try:
        info = pltpu.get_tpu_info()
        vmem_cap = int(getattr(info, "vmem_capacity_bytes", vmem_cap))
        if "v5" in str(getattr(info, "chip_version", "")).lower():
            align = 128                    # v5e MXU is 128x128
    except Exception:
        pass
    return vmem_cap, align


# ---------------------------------------------------------------------------
# Kernel: for each layer, stream weight tiles HBM->VMEM (double-buffered) and run
# Linear -> ReLU -> BatchNorm1d on the resident activation; final layer is Linear only.
# ---------------------------------------------------------------------------
def make_fused_mlp_kernel(layer_specs, matmul_dtype):
    """layer_specs[l] = (d_in_p, d_out_p, tn, num_tiles); last entry is the output layer."""
    n_layers = len(layer_specs)
    n_hidden = n_layers - 1

    def kernel(*refs):
        x_ref = refs[0]
        w_refs = [refs[1 + 2 * l] for l in range(n_layers)]     # HBM: [nt, d_in_p, tn] bf16
        vec_refs = [refs[2 + 2 * l] for l in range(n_layers)]   # VMEM: [8, d_out_p] f32
        o_ref = refs[1 + 2 * n_layers]
        scratch = refs[2 + 2 * n_layers:]
        h_scr = list(scratch[:n_hidden])                        # resident activations (bf16)
        wbuf = list(scratch[n_hidden:n_hidden + n_layers])      # per-layer (2, d_in_p, tn)
        sem = scratch[n_hidden + n_layers]                      # DMA sems (n_layers, 2)

        copies = {}

        def start(l, t):
            slot = t % 2
            cp = pltpu.make_async_copy(w_refs[l].at[t], wbuf[l].at[slot], sem.at[l, slot])
            cp.start()
            copies[(l, t)] = cp

        # Prefetch the first weight tile of every layer up front so layer l+1's first
        # DMA is in flight while layer l computes.
        for l in range(n_layers):
            start(l, 0)

        for l in range(n_layers):
            d_in_p, d_out_p, tn, num_tiles = layer_specs[l]
            is_last = l == n_layers - 1
            # Activation stays in VMEM between layers (bf16).
            h = (x_ref if l == 0 else h_scr[l - 1])[...]        # [B, d_in_p]
            for t in range(num_tiles):
                slot = t % 2
                if t + 1 < num_tiles:
                    start(l, t + 1)                             # prefetch next weight tile
                copies[(l, t)].wait()
                # Linear: MXU matmul (bf16 operands, f32 accumulate) + bias (f32).
                z = jnp.dot(h, wbuf[l][slot], preferred_element_type=jnp.float32)
                z = z + vec_refs[l][0:1, t * tn:(t + 1) * tn]
                if is_last:
                    o_ref[:, t * tn:(t + 1) * tn] = z
                else:
                    # ReLU
                    z = jnp.maximum(z, 0.0)
                    # BatchNorm1d: training-mode batch stats, biased variance, two-pass,
                    # folded into one per-feature scale/shift (exact per feature tile).
                    g = vec_refs[l][1:2, t * tn:(t + 1) * tn]
                    bt = vec_refs[l][2:3, t * tn:(t + 1) * tn]
                    mean = jnp.mean(z, axis=0, keepdims=True)
                    var = jnp.mean((z - mean) ** 2, axis=0, keepdims=True)
                    scale = g * lax.rsqrt(var + EPS)
                    shift = bt - mean * scale
                    h_scr[l][:, t * tn:(t + 1) * tn] = (z * scale + shift).astype(matmul_dtype)

    return kernel


# ---------------------------------------------------------------------------
# Wrapper: pad/pack params, choose per-generation tiling & VMEM budget, one pallas_call.
# ---------------------------------------------------------------------------
def mlp_forward_pallas(x, params):
    ws = list(params["ws"]) + [params["w_out"]]
    bs = list(params["bs"]) + [params["b_out"]]
    gs = list(params["gammas"])
    bts = list(params["betas"])
    n_layers = len(ws)
    n_hidden = n_layers - 1

    B, d_in = x.shape
    vmem_cap, align = _tpu_vmem_and_align()

    d_in_p = _round_up(d_in, align)
    x_p = _pad2d(x.astype(jnp.float32), B, d_in_p).astype(MATMUL_DTYPE)

    inputs = [x_p]
    in_specs = [pl.BlockSpec(memory_space=pltpu.MemorySpace.VMEM)]
    h_scratch, w_scratch = [], []
    layer_specs = []

    vmem_bytes = x_p.size * 2
    weight_bytes = 0
    flops = 0
    transcendentals = 0

    prev_p = d_in_p
    for l in range(n_layers):
        is_last = l == n_layers - 1
        d_out = ws[l].shape[1]
        tn = min(TN_TARGET, _round_up(d_out, align))
        d_out_p = _round_up(d_out, tn)
        nt = d_out_p // tn

        # Weight tiles: contiguous [nt, d_in_p, tn] in HBM, streamed by the kernel.
        w_p = _pad2d(ws[l], prev_p, d_out_p).astype(MATMUL_DTYPE)
        w_tiles = w_p.reshape(prev_p, nt, tn).transpose(1, 0, 2)
        # Packed per-feature vectors: row 0 = bias, 1 = gamma, 2 = beta, rest zero.
        rows = [_pad2d(bs[l].astype(jnp.float32), 1, d_out_p)]
        if not is_last:
            rows += [_pad2d(gs[l].astype(jnp.float32), 1, d_out_p),
                     _pad2d(bts[l].astype(jnp.float32), 1, d_out_p)]
        vec = jnp.concatenate(
            rows + [jnp.zeros((8 - len(rows), d_out_p), jnp.float32)], axis=0)

        inputs += [w_tiles, vec]
        in_specs += [pl.BlockSpec(memory_space=pl.ANY),                     # weights in HBM
                     pl.BlockSpec(memory_space=pltpu.MemorySpace.VMEM)]     # tiny vectors
        w_scratch.append(pltpu.VMEM((2, prev_p, tn), MATMUL_DTYPE))
        if not is_last:
            h_scratch.append(pltpu.VMEM((B, d_out_p), MATMUL_DTYPE))
            vmem_bytes += B * d_out_p * 2
            transcendentals += d_out_p
        vmem_bytes += 2 * prev_p * tn * 2 + 8 * d_out_p * 4
        weight_bytes += int(w_tiles.size) * 2
        flops += 2 * B * prev_p * d_out_p

        layer_specs.append((prev_p, d_out_p, tn, nt))
        prev_p = d_out_p

    latent = ws[-1].shape[1]
    latent_p = prev_p
    vmem_bytes += B * latent_p * 4

    # Generation-aware VMEM budget (footprint + headroom, capped below physical VMEM).
    vmem_limit = int(min(max(2 * vmem_bytes + (4 << 20), 32 << 20), int(0.9 * vmem_cap)))

    cost = pl.CostEstimate(
        flops=flops, transcendentals=transcendentals,
        bytes_accessed=weight_bytes + int(x_p.size) * 2
        + n_layers * 8 * 4 * latent_p + B * latent_p * 4)

    out_p = pl.pallas_call(
        make_fused_mlp_kernel(tuple(layer_specs), MATMUL_DTYPE),
        out_shape=jax.ShapeDtypeStruct((B, latent_p), jnp.float32),
        in_specs=in_specs,
        out_specs=pl.BlockSpec(memory_space=pltpu.MemorySpace.VMEM),
        scratch_shapes=h_scratch + w_scratch + [pltpu.SemaphoreType.DMA((n_layers, 2))],
        compiler_params=pltpu.CompilerParams(vmem_limit_bytes=vmem_limit),
        cost_estimate=cost,
    )(*inputs)
    return out_p[:, :latent]


mlp_forward_pallas_jit = jax.jit(mlp_forward_pallas)


# ---------------------------------------------------------------------------
# Parameter init (PyTorch-Linear-like uniform bounds; BN defaults gamma=1, beta=0)
# ---------------------------------------------------------------------------
def init_params(key, input_dim, hidden_dims, latent_dim):
    ws, bs, gammas, betas = [], [], [], []
    prev = input_dim
    for d in hidden_dims:
        key, kw, kb = jax.random.split(key, 3)
        bound = 1.0 / math.sqrt(prev)
        ws.append(jax.random.uniform(kw, (prev, d), jnp.float32, -bound, bound))
        bs.append(jax.random.uniform(kb, (1, d), jnp.float32, -bound, bound))
        gammas.append(jnp.ones((1, d), jnp.float32))
        betas.append(jnp.zeros((1, d), jnp.float32))
        prev = d
    key, kw, kb = jax.random.split(key, 3)
    bound = 1.0 / math.sqrt(prev)
    w_out = jax.random.uniform(kw, (prev, latent_dim), jnp.float32, -bound, bound)
    b_out = jax.random.uniform(kb, (1, latent_dim), jnp.float32, -bound, bound)
    return {"ws": tuple(ws), "bs": tuple(bs), "gammas": tuple(gammas),
            "betas": tuple(betas), "w_out": w_out, "b_out": b_out}


# ---------------------------------------------------------------------------
# Plain-JAX reference mirroring torch semantics (training-mode BN), same matmul
# precision as the kernel so the comparison isolates kernel bugs.
# ---------------------------------------------------------------------------
def mlp_forward_ref(x, params):
    h = x
    for w, b, g, bt in zip(params["ws"], params["bs"], params["gammas"], params["betas"]):
        z = jnp.dot(h.astype(MATMUL_DTYPE), w.astype(MATMUL_DTYPE),
                    preferred_element_type=jnp.float32) + b
        z = jnp.maximum(z, 0.0)
        mean = jnp.mean(z, axis=0, keepdims=True)
        var = jnp.mean((z - mean) ** 2, axis=0, keepdims=True)
        h = (z - mean) * lax.rsqrt(var + EPS) * g + bt
    return jnp.dot(h.astype(MATMUL_DTYPE), params["w_out"].astype(MATMUL_DTYPE),
                   preferred_element_type=jnp.float32) + params["b_out"]


if __name__ == "__main__":
    # Small shapes consistent with the module: x of shape (batch, input_dim)
    batch = 8
    input_dim = 16
    hidden_dims = [32, 64]
    latent_dim = 8

    key = jax.random.PRNGKey(0)
    key, kx = jax.random.split(key)
    x = jax.random.normal(kx, (batch, input_dim), jnp.float32)
    params = init_params(key, input_dim, hidden_dims, latent_dim)

    out = jax.block_until_ready(mlp_forward_pallas_jit(x, params))
    ref = jax.block_until_ready(mlp_forward_ref(x, params))

    assert out.shape == (batch, latent_dim)
    max_err = float(jnp.max(jnp.abs(out - ref)))
    assert jnp.allclose(out, ref, atol=2e-2, rtol=2e-2), (
        f"mismatch vs reference: max abs diff {max_err}")
    print("KERNEL_OK")
</pallas_src>

<mosaic_0001>
module attributes {stable_mosaic.version = 11 : i64} {
  func.func @kernel(%arg0: memref<8x256xbf16, #tpu.memory_space<vmem>>, %arg1: memref<1x256x256xbf16, #tpu.memory_space<any>>, %arg2: memref<8x256xf32, #tpu.memory_space<vmem>>, %arg3: memref<1x256x256xbf16, #tpu.memory_space<any>>, %arg4: memref<8x256xf32, #tpu.memory_space<vmem>>, %arg5: memref<1x256x256xbf16, #tpu.memory_space<any>>, %arg6: memref<8x256xf32, #tpu.memory_space<vmem>>, %arg7: memref<8x256xf32, #tpu.memory_space<vmem>>, %arg8: memref<8x256xbf16, #tpu.memory_space<vmem>>, %arg9: memref<8x256xbf16, #tpu.memory_space<vmem>>, %arg10: memref<2x256x256xbf16, #tpu.memory_space<vmem>>, %arg11: memref<2x256x256xbf16, #tpu.memory_space<vmem>>, %arg12: memref<2x256x256xbf16, #tpu.memory_space<vmem>>, %arg13: memref<3x2x!tpu.dma_semaphore, #tpu.memory_space<semaphore_mem>>) attributes {dimension_semantics = [], scalar_prefetch = 0 : i64, scratch_operands = 6 : i64, tpu.core_type = #tpu.core_type<tc>} {
    %c0_i32 = arith.constant 0 : i32
    %c0_i32_0 = arith.constant 0 : i32
    %c0_i32_1 = arith.constant 0 : i32
    %c0_i32_2 = arith.constant 0 : i32
    %c0_i32_3 = arith.constant 0 : i32
    %c0_i32_4 = arith.constant 0 : i32
    %0 = tpu.memref_slice %arg1[%c0_i32, %c0_i32_3, %c0_i32_4] : memref<1x256x256xbf16, #tpu.memory_space<any>> -> memref<1x256x256xbf16, #tpu.memory_space<any>>
    %1 = tpu.memref_squeeze %0 : memref<1x256x256xbf16, #tpu.memory_space<any>> -> memref<256x256xbf16, #tpu.memory_space<any>>
    %c0_i32_5 = arith.constant 0 : i32
    %c0_i32_6 = arith.constant 0 : i32
    %2 = tpu.memref_slice %arg10[%c0_i32_0, %c0_i32_5, %c0_i32_6] : memref<2x256x256xbf16, #tpu.memory_space<vmem>> -> memref<1x256x256xbf16, #tpu.memory_space<vmem>>
    %3 = tpu.memref_squeeze %2 : memref<1x256x256xbf16, #tpu.memory_space<vmem>> -> memref<256x256xbf16, #tpu.memory_space<vmem>>
    %4 = tpu.memref_slice %arg13[%c0_i32_1, %c0_i32_2] : memref<3x2x!tpu.dma_semaphore, #tpu.memory_space<semaphore_mem>> -> memref<1x1x!tpu.dma_semaphore, #tpu.memory_space<semaphore_mem>>
    %5 = tpu.memref_squeeze %4 : memref<1x1x!tpu.dma_semaphore, #tpu.memory_space<semaphore_mem>> -> memref<!tpu.dma_semaphore, #tpu.memory_space<semaphore_mem>>
    tpu.enqueue_dma source(%1 : memref<256x256xbf16, #tpu.memory_space<any>>) target(%3 : memref<256x256xbf16, #tpu.memory_space<vmem>>) target_semaphore(%5 : memref<!tpu.dma_semaphore, #tpu.memory_space<semaphore_mem>>)
    %c0_i32_7 = arith.constant 0 : i32
    %c0_i32_8 = arith.constant 0 : i32
    %c1_i32 = arith.constant 1 : i32
    %c0_i32_9 = arith.constant 0 : i32
    %c0_i32_10 = arith.constant 0 : i32
    %c0_i32_11 = arith.constant 0 : i32
    %6 = tpu.memref_slice %arg3[%c0_i32_7, %c0_i32_10, %c0_i32_11] : memref<1x256x256xbf16, #tpu.memory_space<any>> -> memref<1x256x256xbf16, #tpu.memory_space<any>>
    %7 = tpu.memref_squeeze %6 : memref<1x256x256xbf16, #tpu.memory_space<any>> -> memref<256x256xbf16, #tpu.memory_space<any>>
    %c0_i32_12 = arith.constant 0 : i32
    %c0_i32_13 = arith.constant 0 : i32
    %8 = tpu.memref_slice %arg11[%c0_i32_8, %c0_i32_12, %c0_i32_13] : memref<2x256x256xbf16, #tpu.memory_space<vmem>> -> memref<1x256x256xbf16, #tpu.memory_space<vmem>>
    %9 = tpu.memref_squeeze %8 : memref<1x256x256xbf16, #tpu.memory_space<vmem>> -> memref<256x256xbf16, #tpu.memory_space<vmem>>
    %10 = tpu.memref_slice %arg13[%c1_i32, %c0_i32_9] : memref<3x2x!tpu.dma_semaphore, #tpu.memory_space<semaphore_mem>> -> memref<1x1x!tpu.dma_semaphore, #tpu.memory_space<semaphore_mem>>
    %11 = tpu.memref_squeeze %10 : memref<1x1x!tpu.dma_semaphore, #tpu.memory_space<semaphore_mem>> -> memref<!tpu.dma_semaphore, #tpu.memory_space<semaphore_mem>>
    tpu.enqueue_dma source(%7 : memref<256x256xbf16, #tpu.memory_space<any>>) target(%9 : memref<256x256xbf16, #tpu.memory_space<vmem>>) target_semaphore(%11 : memref<!tpu.dma_semaphore, #tpu.memory_space<semaphore_mem>>)
    %c0_i32_14 = arith.constant 0 : i32
    %c0_i32_15 = arith.constant 0 : i32
    %c2_i32 = arith.constant 2 : i32
    %c0_i32_16 = arith.constant 0 : i32
    %c0_i32_17 = arith.constant 0 : i32
    %c0_i32_18 = arith.constant 0 : i32
    %12 = tpu.memref_slice %arg5[%c0_i32_14, %c0_i32_17, %c0_i32_18] : memref<1x256x256xbf16, #tpu.memory_space<any>> -> memref<1x256x256xbf16, #tpu.memory_space<any>>
    %13 = tpu.memref_squeeze %12 : memref<1x256x256xbf16, #tpu.memory_space<any>> -> memref<256x256xbf16, #tpu.memory_space<any>>
    %c0_i32_19 = arith.constant 0 : i32
    %c0_i32_20 = arith.constant 0 : i32
    %14 = tpu.memref_slice %arg12[%c0_i32_15, %c0_i32_19, %c0_i32_20] : memref<2x256x256xbf16, #tpu.memory_space<vmem>> -> memref<1x256x256xbf16, #tpu.memory_space<vmem>>
    %15 = tpu.memref_squeeze %14 : memref<1x256x256xbf16, #tpu.memory_space<vmem>> -> memref<256x256xbf16, #tpu.memory_space<vmem>>
    %16 = tpu.memref_slice %arg13[%c2_i32, %c0_i32_16] : memref<3x2x!tpu.dma_semaphore, #tpu.memory_space<semaphore_mem>> -> memref<1x1x!tpu.dma_semaphore, #tpu.memory_space<semaphore_mem>>
    %17 = tpu.memref_squeeze %16 : memref<1x1x!tpu.dma_semaphore, #tpu.memory_space<semaphore_mem>> -> memref<!tpu.dma_semaphore, #tpu.memory_space<semaphore_mem>>
    tpu.enqueue_dma source(%13 : memref<256x256xbf16, #tpu.memory_space<any>>) target(%15 : memref<256x256xbf16, #tpu.memory_space<vmem>>) target_semaphore(%17 : memref<!tpu.dma_semaphore, #tpu.memory_space<semaphore_mem>>)
    %c0 = arith.constant 0 : index
    %c0_21 = arith.constant 0 : index
    %18 = vector.load %arg0[%c0, %c0_21] : memref<8x256xbf16, #tpu.memory_space<vmem>>, vector<8x256xbf16>
    %c0_i32_22 = arith.constant 0 : i32
    %c0_i32_23 = arith.constant 0 : i32
    %c0_i32_24 = arith.constant 0 : i32
    %c0_i32_25 = arith.constant 0 : i32
    %c0_i32_26 = arith.constant 0 : i32
    %c0_i32_27 = arith.constant 0 : i32
    %19 = tpu.memref_slice %arg1[%c0_i32_22, %c0_i32_26, %c0_i32_27] : memref<1x256x256xbf16, #tpu.memory_space<any>> -> memref<1x256x256xbf16, #tpu.memory_space<any>>
    %20 = tpu.memref_squeeze %19 : memref<1x256x256xbf16, #tpu.memory_space<any>> -> memref<256x256xbf16, #tpu.memory_space<any>>
    %c0_i32_28 = arith.constant 0 : i32
    %c0_i32_29 = arith.constant 0 : i32
    %21 = tpu.memref_slice %arg10[%c0_i32_23, %c0_i32_28, %c0_i32_29] : memref<2x256x256xbf16, #tpu.memory_space<vmem>> -> memref<1x256x256xbf16, #tpu.memory_space<vmem>>
    %22 = tpu.memref_squeeze %21 : memref<1x256x256xbf16, #tpu.memory_space<vmem>> -> memref<256x256xbf16, #tpu.memory_space<vmem>>
    %23 = tpu.memref_slice %arg13[%c0_i32_24, %c0_i32_25] : memref<3x2x!tpu.dma_semaphore, #tpu.memory_space<semaphore_mem>> -> memref<1x1x!tpu.dma_semaphore, #tpu.memory_space<semaphore_mem>>
    %24 = tpu.memref_squeeze %23 : memref<1x1x!tpu.dma_semaphore, #tpu.memory_space<semaphore_mem>> -> memref<!tpu.dma_semaphore, #tpu.memory_space<semaphore_mem>>
    tpu.wait_dma2 semaphore(%24 : memref<!tpu.dma_semaphore, #tpu.memory_space<semaphore_mem>>) src(%20 : memref<256x256xbf16, #tpu.memory_space<any>>) dst(%22 : memref<256x256xbf16, #tpu.memory_space<vmem>>)
    %c0_30 = arith.constant 0 : index
    %c0_31 = arith.constant 0 : index
    %c0_32 = arith.constant 0 : index
    %25 = vector.load %arg10[%c0_30, %c0_31, %c0_32] : memref<2x256x256xbf16, #tpu.memory_space<vmem>>, vector<1x256x256xbf16>
    %26 = vector.shape_cast %25 : vector<1x256x256xbf16> to vector<256x256xbf16>
    %cst = arith.constant dense<0.000000e+00> : vector<8x256xf32>
    %27 = tpu.matmul %18, %26, %cst {dimension_numbers = #tpu.dot_dimension_numbers<[1], [0], [0], [1], [0, 0, 1, 1], [], []>} : vector<8x256xbf16>, vector<256x256xbf16>, vector<8x256xf32> -> vector<8x256xf32>
    %c0_33 = arith.constant 0 : index
    %c0_34 = arith.constant 0 : index
    %28 = vector.load %arg2[%c0_33, %c0_34] : memref<8x256xf32, #tpu.memory_space<vmem>>, vector<1x256xf32>
    %29 = vector.broadcast %28 : vector<1x256xf32> to vector<8x256xf32>
    %30 = arith.addf %27, %29 : vector<8x256xf32>
    %cst_35 = arith.constant 0.000000e+00 : f32
    %31 = vector.broadcast %cst_35 : f32 to vector<8x256xf32>
    %32 = arith.maximumf %30, %31 : vector<8x256xf32>
    %c1 = arith.constant 1 : index
    %c0_36 = arith.constant 0 : index
    %33 = vector.load %arg2[%c1, %c0_36] : memref<8x256xf32, #tpu.memory_space<vmem>>, vector<1x256xf32>
    %c2 = arith.constant 2 : index
    %c0_37 = arith.constant 0 : index
    %34 = vector.load %arg2[%c2, %c0_37] : memref<8x256xf32, #tpu.memory_space<vmem>>, vector<1x256xf32>
    %cst_38 = arith.constant dense<0.000000e+00> : vector<256xf32>
    %35 = vector.multi_reduction <add>, %32, %cst_38 [0] : vector<8x256xf32> to vector<256xf32>
    %36 = vector.shape_cast %35 : vector<256xf32> to vector<1x256xf32>
    %cst_39 = arith.constant 8.000000e+00 : f32
    %37 = vector.broadcast %cst_39 : f32 to vector<1x256xf32>
    %38 = arith.divf %36, %37 : vector<1x256xf32>
    %39 = vector.broadcast %38 : vector<1x256xf32> to vector<8x256xf32>
    %40 = arith.subf %32, %39 : vector<8x256xf32>
    %41 = arith.mulf %40, %40 : vector<8x256xf32>
    %cst_40 = arith.constant dense<0.000000e+00> : vector<256xf32>
    %42 = vector.multi_reduction <add>, %41, %cst_40 [0] : vector<8x256xf32> to vector<256xf32>
    %43 = vector.shape_cast %42 : vector<256xf32> to vector<1x256xf32>
    %cst_41 = arith.constant 8.000000e+00 : f32
    %44 = vector.broadcast %cst_41 : f32 to vector<1x256xf32>
    %45 = arith.divf %43, %44 : vector<1x256xf32>
    %cst_42 = arith.constant 9.99999974E-6 : f32
    %46 = vector.broadcast %cst_42 : f32 to vector<1x256xf32>
    %47 = arith.addf %45, %46 : vector<1x256xf32>
    %48 = math.rsqrt %47 : vector<1x256xf32>
    %49 = arith.mulf %33, %48 : vector<1x256xf32>
    %50 = arith.mulf %38, %49 : vector<1x256xf32>
    %51 = arith.subf %34, %50 : vector<1x256xf32>
    %52 = vector.broadcast %49 : vector<1x256xf32> to vector<8x256xf32>
    %53 = arith.mulf %32, %52 : vector<8x256xf32>
    %54 = vector.broadcast %51 : vector<1x256xf32> to vector<8x256xf32>
    %55 = arith.addf %53, %54 : vector<8x256xf32>
    %56 = arith.truncf %55 : vector<8x256xf32> to vector<8x256xbf16>
    %c0_43 = arith.constant 0 : index
    %c0_44 = arith.constant 0 : index
    %57 = vector.load %arg8[%c0_43, %c0_44] : memref<8x256xbf16, #tpu.memory_space<vmem>>, vector<8x256xbf16>
    tpu.vector_store %arg8[%c0_43, %c0_44], %56 {strides = array<i32>} : memref<8x256xbf16, #tpu.memory_space<vmem>>, vector<8x256xbf16>,
    %c0_45 = arith.constant 0 : index
    %c0_46 = arith.constant 0 : index
    %58 = vector.load %arg8[%c0_45, %c0_46] : memref<8x256xbf16, #tpu.memory_space<vmem>>, vector<8x256xbf16>
    %c0_i32_47 = arith.constant 0 : i32
    %c0_i32_48 = arith.constant 0 : i32
    %c1_i32_49 = arith.constant 1 : i32
    %c0_i32_50 = arith.constant 0 : i32
    %c0_i32_51 = arith.constant 0 : i32
    %c0_i32_52 = arith.constant 0 : i32
    %59 = tpu.memref_slice %arg3[%c0_i32_47, %c0_i32_51, %c0_i32_52] : memref<1x256x256xbf16, #tpu.memory_space<any>> -> memref<1x256x256xbf16, #tpu.memory_space<any>>
    %60 = tpu.memref_squeeze %59 : memref<1x256x256xbf16, #tpu.memory_space<any>> -> memref<256x256xbf16, #tpu.memory_space<any>>
    %c0_i32_53 = arith.constant 0 : i32
    %c0_i32_54 = arith.constant 0 : i32
    %61 = tpu.memref_slice %arg11[%c0_i32_48, %c0_i32_53, %c0_i32_54] : memref<2x256x256xbf16, #tpu.memory_space<vmem>> -> memref<1x256x256xbf16, #tpu.memory_space<vmem>>
    %62 = tpu.memref_squeeze %61 : memref<1x256x256xbf16, #tpu.memory_space<vmem>> -> memref<256x256xbf16, #tpu.memory_space<vmem>>
    %63 = tpu.memref_slice %arg13[%c1_i32_49, %c0_i32_50] : memref<3x2x!tpu.dma_semaphore, #tpu.memory_space<semaphore_mem>> -> memref<1x1x!tpu.dma_semaphore, #tpu.memory_space<semaphore_mem>>
    %64 = tpu.memref_squeeze %63 : memref<1x1x!tpu.dma_semaphore, #tpu.memory_space<semaphore_mem>> -> memref<!tpu.dma_semaphore, #tpu.memory_space<semaphore_mem>>
    tpu.wait_dma2 semaphore(%64 : memref<!tpu.dma_semaphore, #tpu.memory_space<semaphore_mem>>) src(%60 : memref<256x256xbf16, #tpu.memory_space<any>>) dst(%62 : memref<256x256xbf16, #tpu.memory_space<vmem>>)
    %c0_55 = arith.constant 0 : index
    %c0_56 = arith.constant 0 : index
    %c0_57 = arith.constant 0 : index
    %65 = vector.load %arg11[%c0_55, %c0_56, %c0_57] : memref<2x256x256xbf16, #tpu.memory_space<vmem>>, vector<1x256x256xbf16>
    %66 = vector.shape_cast %65 : vector<1x256x256xbf16> to vector<256x256xbf16>
    %cst_58 = arith.constant dense<0.000000e+00> : vector<8x256xf32>
    %67 = tpu.matmul %58, %66, %cst_58 {dimension_numbers = #tpu.dot_dimension_numbers<[1], [0], [0], [1], [0, 0, 1, 1], [], []>} : vector<8x256xbf16>, vector<256x256xbf16>, vector<8x256xf32> -> vector<8x256xf32>
    %c0_59 = arith.constant 0 : index
    %c0_60 = arith.constant 0 : index
    %68 = vector.load %arg4[%c0_59, %c0_60] : memref<8x256xf32, #tpu.memory_space<vmem>>, vector<1x256xf32>
    %69 = vector.broadcast %68 : vector<1x256xf32> to vector<8x256xf32>
    %70 = arith.addf %67, %69 : vector<8x256xf32>
    %cst_61 = arith.constant 0.000000e+00 : f32
    %71 = vector.broadcast %cst_61 : f32 to vector<8x256xf32>
    %72 = arith.maximumf %70, %71 : vector<8x256xf32>
    %c1_62 = arith.constant 1 : index
    %c0_63 = arith.constant 0 : index
    %73 = vector.load %arg4[%c1_62, %c0_63] : memref<8x256xf32, #tpu.memory_space<vmem>>, vector<1x256xf32>
    %c2_64 = arith.constant 2 : index
    %c0_65 = arith.constant 0 : index
    %74 = vector.load %arg4[%c2_64, %c0_65] : memref<8x256xf32, #tpu.memory_space<vmem>>, vector<1x256xf32>
    %cst_66 = arith.constant dense<0.000000e+00> : vector<256xf32>
    %75 = vector.multi_reduction <add>, %72, %cst_66 [0] : vector<8x256xf32> to vector<256xf32>
    %76 = vector.shape_cast %75 : vector<256xf32> to vector<1x256xf32>
    %cst_67 = arith.constant 8.000000e+00 : f32
    %77 = vector.broadcast %cst_67 : f32 to vector<1x256xf32>
    %78 = arith.divf %76, %77 : vector<1x256xf32>
    %79 = vector.broadcast %78 : vector<1x256xf32> to vector<8x256xf32>
    %80 = arith.subf %72, %79 : vector<8x256xf32>
    %81 = arith.mulf %80, %80 : vector<8x256xf32>
    %cst_68 = arith.constant dense<0.000000e+00> : vector<256xf32>
    %82 = vector.multi_reduction <add>, %81, %cst_68 [0] : vector<8x256xf32> to vector<256xf32>
    %83 = vector.shape_cast %82 : vector<256xf32> to vector<1x256xf32>
    %cst_69 = arith.constant 8.000000e+00 : f32
    %84 = vector.broadcast %cst_69 : f32 to vector<1x256xf32>
    %85 = arith.divf %83, %84 : vector<1x256xf32>
    %cst_70 = arith.constant 9.99999974E-6 : f32
    %86 = vector.broadcast %cst_70 : f32 to vector<1x256xf32>
    %87 = arith.addf %85, %86 : vector<1x256xf32>
    %88 = math.rsqrt %87 : vector<1x256xf32>
    %89 = arith.mulf %73, %88 : vector<1x256xf32>
    %90 = arith.mulf %78, %89 : vector<1x256xf32>
    %91 = arith.subf %74, %90 : vector<1x256xf32>
    %92 = vector.broadcast %89 : vector<1x256xf32> to vector<8x256xf32>
    %93 = arith.mulf %72, %92 : vector<8x256xf32>
    %94 = vector.broadcast %91 : vector<1x256xf32> to vector<8x256xf32>
    %95 = arith.addf %93, %94 : vector<8x256xf32>
    %96 = arith.truncf %95 : vector<8x256xf32> to vector<8x256xbf16>
    %c0_71 = arith.constant 0 : index
    %c0_72 = arith.constant 0 : index
    %97 = vector.load %arg9[%c0_71, %c0_72] : memref<8x256xbf16, #tpu.memory_space<vmem>>, vector<8x256xbf16>
    tpu.vector_store %arg9[%c0_71, %c0_72], %96 {strides = array<i32>} : memref<8x256xbf16, #tpu.memory_space<vmem>>, vector<8x256xbf16>,
    %c0_73 = arith.constant 0 : index
    %c0_74 = arith.constant 0 : index
    %98 = vector.load %arg9[%c0_73, %c0_74] : memref<8x256xbf16, #tpu.memory_space<vmem>>, vector<8x256xbf16>
    %c0_i32_75 = arith.constant 0 : i32
    %c0_i32_76 = arith.constant 0 : i32
    %c2_i32_77 = arith.constant 2 : i32
    %c0_i32_78 = arith.constant 0 : i32
    %c0_i32_79 = arith.constant 0 : i32
    %c0_i32_80 = arith.constant 0 : i32
    %99 = tpu.memref_slice %arg5[%c0_i32_75, %c0_i32_79, %c0_i32_80] : memref<1x256x256xbf16, #tpu.memory_space<any>> -> memref<1x256x256xbf16, #tpu.memory_space<any>>
    %100 = tpu.memref_squeeze %99 : memref<1x256x256xbf16, #tpu.memory_space<any>> -> memref<256x256xbf16, #tpu.memory_space<any>>
    %c0_i32_81 = arith.constant 0 : i32
    %c0_i32_82 = arith.constant 0 : i32
    %101 = tpu.memref_slice %arg12[%c0_i32_76, %c0_i32_81, %c0_i32_82] : memref<2x256x256xbf16, #tpu.memory_space<vmem>> -> memref<1x256x256xbf16, #tpu.memory_space<vmem>>
    %102 = tpu.memref_squeeze %101 : memref<1x256x256xbf16, #tpu.memory_space<vmem>> -> memref<256x256xbf16, #tpu.memory_space<vmem>>
    %103 = tpu.memref_slice %arg13[%c2_i32_77, %c0_i32_78] : memref<3x2x!tpu.dma_semaphore, #tpu.memory_space<semaphore_mem>> -> memref<1x1x!tpu.dma_semaphore, #tpu.memory_space<semaphore_mem>>
    %104 = tpu.memref_squeeze %103 : memref<1x1x!tpu.dma_semaphore, #tpu.memory_space<semaphore_mem>> -> memref<!tpu.dma_semaphore, #tpu.memory_space<semaphore_mem>>
    tpu.wait_dma2 semaphore(%104 : memref<!tpu.dma_semaphore, #tpu.memory_space<semaphore_mem>>) src(%100 : memref<256x256xbf16, #tpu.memory_space<any>>) dst(%102 : memref<256x256xbf16, #tpu.memory_space<vmem>>)
    %c0_83 = arith.constant 0 : index
    %c0_84 = arith.constant 0 : index
    %c0_85 = arith.constant 0 : index
    %105 = vector.load %arg12[%c0_83, %c0_84, %c0_85] : memref<2x256x256xbf16, #tpu.memory_space<vmem>>, vector<1x256x256xbf16>
    %106 = vector.shape_cast %105 : vector<1x256x256xbf16> to vector<256x256xbf16>
    %cst_86 = arith.constant dense<0.000000e+00> : vector<8x256xf32>
    %107 = tpu.matmul %98, %106, %cst_86 {dimension_numbers = #tpu.dot_dimension_numbers<[1], [0], [0], [1], [0, 0, 1, 1], [], []>} : vector<8x256xbf16>, vector<256x256xbf16>, vector<8x256xf32> -> vector<8x256xf32>
    %c0_87 = arith.constant 0 : index
    %c0_88 = arith.constant 0 : index
    %108 = vector.load %arg6[%c0_87, %c0_88] : memref<8x256xf32, #tpu.memory_space<vmem>>, vector<1x256xf32>
    %109 = vector.broadcast %108 : vector<1x256xf32> to vector<8x256xf32>
    %110 = arith.addf %107, %109 : vector<8x256xf32>
    %c0_89 = arith.constant 0 : index
    %c0_90 = arith.constant 0 : index
    %111 = vector.load %arg7[%c0_89, %c0_90] : memref<8x256xf32, #tpu.memory_space<vmem>>, vector<8x256xf32>
    tpu.vector_store %arg7[%c0_89, %c0_90], %110 {strides = array<i32>} : memref<8x256xf32, #tpu.memory_space<vmem>>, vector<8x256xf32>,
    return
  }
}

</mosaic_0001>

<bundles_post_ra>
// kernel: mlp_forward_pallas.1
= control target key start
LH: loop header
LB: loop body
LE: loop exit
PB: predicated region body
PF: predicated region fallthrough
CT: control target
= control target key end

     0   :  { %s2330_s0 = inlined_call_operand.vmem [shape: bf16[8,256], index: 0, kind: input, shape index: {}]   ;;  %s2331_s1 = inlined_call_operand.vmem [shape: bf16[1,256,256], index: 1, kind: input, shape index: {}]   ;;  %s2332_s2 = inlined_call_operand.vmem [shape: f32[8,256], index: 2, kind: input, shape index: {}]   ;;  %s2333_s3 = inlined_call_operand.vmem [shape: bf16[1,256,256], index: 3, kind: input, shape index: {}]   ;;  %s2334_s4 = inlined_call_operand.vmem [shape: f32[8,256], index: 4, kind: input, shape index: {}]   ;;  %s2335_s5 = inlined_call_operand.vmem [shape: bf16[1,256,256], index: 5, kind: input, shape index: {}]   ;;  %s2336_s6 = inlined_call_operand.vmem [shape: f32[8,256], index: 6, kind: input, shape index: {}]   ;;  %s2337_s7 = inlined_call_operand.vmem [shape: f32[8,256], index: 7, kind: output, shape index: {}]  }
   0x1   :  { %v1589_v0 = vld [vmem:[%s2331_s1] sm:$0xff]  ;;  %v1594_v1 = vld [vmem:[%s2331_s1 + $0x8] sm:$0xff]  ;;  %v1599_v2 = vld [vmem:[%s2331_s1 + $0x10] sm:$0xff] }
   0x2   :  { %v1604_v3 = vld [vmem:[%s2331_s1 + $0x18] sm:$0xff]  ;;  %v1609_v4 = vld [vmem:[%s2331_s1 + $0x20] sm:$0xff]  ;;  %v1614_v5 = vld [vmem:[%s2331_s1 + $0x28] sm:$0xff] }
   0x3   :  { %v1619_v6 = vld [vmem:[%s2331_s1 + $0x30] sm:$0xff]  ;;  %v1624_v7 = vld [vmem:[%s2331_s1 + $0x38] sm:$0xff]  ;;  %v1629_v8 = vld [vmem:[%s2331_s1 + $0x40] sm:$0xff] }
   0x4   :  { %v1634_v9 = vld [vmem:[%s2331_s1 + $0x48] sm:$0xff]  ;;  %v1639_v10 = vld [vmem:[%s2331_s1 + $0x50] sm:$0xff]  ;;  %v1644_v11 = vld [vmem:[%s2331_s1 + $0x58] sm:$0xff] }
   0x5   :  { %v1649_v12 = vld [vmem:[%s2331_s1 + $0x60] sm:$0xff]  ;;  %v1654_v13 = vld [vmem:[%s2331_s1 + $0x68] sm:$0xff]  ;;  %v1659_v14 = vld [vmem:[%s2331_s1 + $0x70] sm:$0xff] }
   0x6   :  { %v1664_v15 = vld [vmem:[%s2331_s1 + $0x78] sm:$0xff]  ;;  %v1669_v16 = vld [vmem:[%s2331_s1 + $0x80] sm:$0xff]  ;;  %v1674_v17 = vld [vmem:[%s2331_s1 + $0x88] sm:$0xff] }
   0x7   :  { %v1679_v18 = vld [vmem:[%s2331_s1 + $0x90] sm:$0xff]  ;;  %v1684_v19 = vld [vmem:[%s2331_s1 + $0x98] sm:$0xff]  ;;  %v1689_v20 = vld [vmem:[%s2331_s1 + $0xa0] sm:$0xff] }
   0x8   :  { %v1694_v21 = vld [vmem:[%s2331_s1 + $0xa8] sm:$0xff]  ;;  %v1699_v22 = vld [vmem:[%s2331_s1 + $0xb0] sm:$0xff]  ;;  %v1704_v23 = vld [vmem:[%s2331_s1 + $0xb8] sm:$0xff] }
   0x9   :  { %v1709_v24 = vld [vmem:[%s2331_s1 + $0xc0] sm:$0xff]  ;;  %v1714_v25 = vld [vmem:[%s2331_s1 + $0xc8] sm:$0xff]  ;;  %v1719_v26 = vld [vmem:[%s2331_s1 + $0xd0] sm:$0xff] }
   0xa   :  { %v1724_v27 = vld [vmem:[%s2331_s1 + $0xd8] sm:$0xff]  ;;  %v1729_v28 = vld [vmem:[%s2331_s1 + $0xe0] sm:$0xff]  ;;  %v1734_v29 = vld [vmem:[%s2331_s1 + $0xe8] sm:$0xff] }
   0xb   :  { %v1739_v30 = vld [vmem:[%s2331_s1 + $0xf0] sm:$0xff]  ;;  %v1744_v31 = vld [vmem:[%s2331_s1 + $0xf8] sm:$0xff] }
   0xc   :  { %124 = vsyncadd [#allocation7], 4096  ;;  %v1749_v32 = vld [vmem:[%s2333_s3] sm:$0xff]  ;;  %v1754_v33 = vld [vmem:[%s2333_s3 + $0x8] sm:$0xff] }
   0xd   :  { %v1759_v34 = vld [vmem:[%s2333_s3 + $0x10] sm:$0xff]  ;;  %v1764_v35 = vld [vmem:[%s2333_s3 + $0x18] sm:$0xff]  ;;  %v1769_v36 = vld [vmem:[%s2333_s3 + $0x20] sm:$0xff] }
   0xe   :  { %v1774_v37 = vld [vmem:[%s2333_s3 + $0x28] sm:$0xff]  ;;  %v1779_v38 = vld [vmem:[%s2333_s3 + $0x30] sm:$0xff]  ;;  %v1784_v39 = vld [vmem:[%s2333_s3 + $0x38] sm:$0xff] }
   0xf   :  { %v1789_v40 = vld [vmem:[%s2333_s3 + $0x40] sm:$0xff]  ;;  %v1794_v41 = vld [vmem:[%s2333_s3 + $0x48] sm:$0xff]  ;;  %v1799_v42 = vld [vmem:[%s2333_s3 + $0x50] sm:$0xff] }
  0x10   :  { %v1804_v43 = vld [vmem:[%s2333_s3 + $0x58] sm:$0xff]  ;;  %v1809_v44 = vld [vmem:[%s2333_s3 + $0x60] sm:$0xff]  ;;  %v1814_v45 = vld [vmem:[%s2333_s3 + $0x68] sm:$0xff] }
  0x11   :  { %v1819_v46 = vld [vmem:[%s2333_s3 + $0x70] sm:$0xff]  ;;  %v1824_v47 = vld [vmem:[%s2333_s3 + $0x78] sm:$0xff]  ;;  %v1829_v48 = vld [vmem:[%s2333_s3 + $0x80] sm:$0xff] }
  0x12   :  { %2377 = vst [vmem:[#allocation14_spill] sm:$0xff] %v1829_v48  ;;  %v1834_v49 = vld [vmem:[%s2333_s3 + $0x88] sm:$0xff]  ;;  %v1839_v50 = vld [vmem:[%s2333_s3 + $0x90] sm:$0xff]  ;;  %v1844_v51 = vld [vmem:[%s2333_s3 + $0x98] sm:$0xff] }
  0x13   :  { %2378 = vst [vmem:[#allocation15_spill] sm:$0xff] %v1834_v49  ;;  %2379 = vst [vmem:[#allocation16_spill] sm:$0xff] %v1839_v50  ;;  %v1849_v52 = vld [vmem:[%s2333_s3 + $0xa0] sm:$0xff]  ;;  %v1854_v53 = vld [vmem:[%s2333_s3 + $0xa8] sm:$0xff] }
  0x14   :  { %2380 = vst [vmem:[#allocation17_spill] sm:$0xff] %v1844_v51  ;;  %2381 = vst [vmem:[#allocation18_spill] sm:$0xff] %v1849_v52  ;;  %v1859_v54 = vld [vmem:[%s2333_s3 + $0xb0] sm:$0xff]  ;;  %v1864_v55 = vld [vmem:[%s2333_s3 + $0xb8] sm:$0xff] }
  0x15   :  { %2382 = vst [vmem:[#allocation19_spill] sm:$0xff] %v1854_v53  ;;  %2383 = vst [vmem:[#allocation20_spill] sm:$0xff] %v1859_v54  ;;  %v1869_v56 = vld [vmem:[%s2333_s3 + $0xc0] sm:$0xff]  ;;  %v1874_v57 = vld [vmem:[%s2333_s3 + $0xc8] sm:$0xff] }
  0x16   :  { %v1879_v58 = vld [vmem:[%s2333_s3 + $0xd0] sm:$0xff]  ;;  %v1884_v59 = vld [vmem:[%s2333_s3 + $0xd8] sm:$0xff]  ;;  %v1889_v60 = vld [vmem:[%s2333_s3 + $0xe0] sm:$0xff] }
  0x17   :  { %v1894_v61 = vld [vmem:[%s2333_s3 + $0xe8] sm:$0xff]  ;;  %v1899_v62 = vld [vmem:[%s2333_s3 + $0xf0] sm:$0xff]  ;;  %v1904_v63 = vld [vmem:[%s2333_s3 + $0xf8] sm:$0xff] }
  0x18   :  { %230 = vsyncadd [#allocation7 + $0x2], 4096  ;;  %v1909_v48 = vld [vmem:[%s2335_s5] sm:$0xff]  ;;  %v1914_v49 = vld [vmem:[%s2335_s5 + $0x8] sm:$0xff] }
  0x19   :  { %2384 = vst [vmem:[#allocation21_spill] sm:$0xff] %v1909_v48  ;;  %2385 = vst [vmem:[#allocation22_spill] sm:$0xff] %v1914_v49  ;;  %v1919_v50 = vld [vmem:[%s2335_s5 + $0x10] sm:$0xff]  ;;  %v1924_v51 = vld [vmem:[%s2335_s5 + $0x18] sm:$0xff] }
  0x1a   :  { %2386 = vst [vmem:[#allocation23_spill] sm:$0xff] %v1919_v50  ;;  %2387 = vst [vmem:[#allocation24_spill] sm:$0xff] %v1924_v51  ;;  %v1929_v52 = vld [vmem:[%s2335_s5 + $0x20] sm:$0xff]  ;;  %v1934_v48 = vld [vmem:[%s2335_s5 + $0x28] sm:$0xff] }
  0x1b   :  { %2388 = vst [vmem:[#allocation25_spill] sm:$0xff] %v1929_v52  ;;  %2389 = vst [vmem:[#allocation26_spill] sm:$0xff] %v1934_v48  ;;  %v1939_v49 = vld [vmem:[%s2335_s5 + $0x30] sm:$0xff]  ;;  %v1944_v50 = vld [vmem:[%s2335_s5 + $0x38] sm:$0xff] }
  0x1c   :  { %2390 = vst [vmem:[#allocation27_spill] sm:$0xff] %v1939_v49  ;;  %2391 = vst [vmem:[#allocation28_spill] sm:$0xff] %v1944_v50  ;;  %v1949_v51 = vld [vmem:[%s2335_s5 + $0x40] sm:$0xff]  ;;  %v1954_v52 = vld [vmem:[%s2335_s5 + $0x48] sm:$0xff] }
  0x1d   :  { %2392 = vst [vmem:[#allocation29_spill] sm:$0xff] %v1949_v51  ;;  %2393 = vst [vmem:[#allocation30_spill] sm:$0xff] %v1954_v52  ;;  %v1959_v48 = vld [vmem:[%s2335_s5 + $0x50] sm:$0xff]  ;;  %v1964_v49 = vld [vmem:[%s2335_s5 + $0x58] sm:$0xff] }
  0x1e   :  { %2394 = vst [vmem:[#allocation31_spill] sm:$0xff] %v1959_v48  ;;  %2395 = vst [vmem:[#allocation32_spill] sm:$0xff] %v1964_v49  ;;  %v1969_v50 = vld [vmem:[%s2335_s5 + $0x60] sm:$0xff]  ;;  %v1974_v51 = vld [vmem:[%s2335_s5 + $0x68] sm:$0xff] }
  0x1f   :  { %2396 = vst [vmem:[#allocation33_spill] sm:$0xff] %v1969_v50  ;;  %2397 = vst [vmem:[#allocation34_spill] sm:$0xff] %v1974_v51  ;;  %v1979_v52 = vld [vmem:[%s2335_s5 + $0x70] sm:$0xff]  ;;  %v1984_v48 = vld [vmem:[%s2335_s5 + $0x78] sm:$0xff] }
  0x20   :  { %2398 = vst [vmem:[#allocation35_spill] sm:$0xff] %v1979_v52  ;;  %2399 = vst [vmem:[#allocation36_spill] sm:$0xff] %v1984_v48  ;;  %v1989_v49 = vld [vmem:[%s2335_s5 + $0x80] sm:$0xff]  ;;  %v1994_v50 = vld [vmem:[%s2335_s5 + $0x88] sm:$0xff] }
  0x21   :  { %2400 = vst [vmem:[#allocation37_spill] sm:$0xff] %v1989_v49  ;;  %2401 = vst [vmem:[#allocation38_spill] sm:$0xff] %v1994_v50  ;;  %v1999_v51 = vld [vmem:[%s2335_s5 + $0x90] sm:$0xff]  ;;  %v2004_v52 = vld [vmem:[%s2335_s5 + $0x98] sm:$0xff] }
  0x22   :  { %2402 = vst [vmem:[#allocation39_spill] sm:$0xff] %v1999_v51  ;;  %2403 = vst [vmem:[#allocation40_spill] sm:$0xff] %v2004_v52  ;;  %v2009_v48 = vld [vmem:[%s2335_s5 + $0xa0] sm:$0xff]  ;;  %v2014_v49 = vld [vmem:[%s2335_s5 + $0xa8] sm:$0xff] }
  0x23   :  { %2404 = vst [vmem:[#allocation41_spill] sm:$0xff] %v2009_v48  ;;  %2405 = vst [vmem:[#allocation42_spill] sm:$0xff] %v2014_v49  ;;  %v2019_v50 = vld [vmem:[%s2335_s5 + $0xb0] sm:$0xff]  ;;  %v2024_v51 = vld [vmem:[%s2335_s5 + $0xb8] sm:$0xff] }
  0x24   :  { %2406 = vst [vmem:[#allocation43_spill] sm:$0xff] %v2019_v50  ;;  %2407 = vst [vmem:[#allocation44_spill] sm:$0xff] %v2024_v51  ;;  %v2029_v52 = vld [vmem:[%s2335_s5 + $0xc0] sm:$0xff]  ;;  %v2034_v48 = vld [vmem:[%s2335_s5 + $0xc8] sm:$0xff] }
  0x25   :  { %2408 = vst [vmem:[#allocation45_spill] sm:$0xff] %v2029_v52  ;;  %2409 = vst [vmem:[#allocation46_spill] sm:$0xff] %v2034_v48  ;;  %v2039_v49 = vld [vmem:[%s2335_s5 + $0xd0] sm:$0xff]  ;;  %v2044_v50 = vld [vmem:[%s2335_s5 + $0xd8] sm:$0xff] }
  0x26   :  { %2410 = vst [vmem:[#allocation47_spill] sm:$0xff] %v2039_v49  ;;  %2411 = vst [vmem:[#allocation48_spill] sm:$0xff] %v2044_v50  ;;  %v2049_v51 = vld [vmem:[%s2335_s5 + $0xe0] sm:$0xff]  ;;  %v2054_v52 = vld [vmem:[%s2335_s5 + $0xe8] sm:$0xff] }
  0x27   :  { %2412 = vst [vmem:[#allocation49_spill] sm:$0xff] %v2049_v51  ;;  %2413 = vst [vmem:[#allocation50_spill] sm:$0xff] %v2054_v52  ;;  %v2059_v48 = vld [vmem:[%s2335_s5 + $0xf0] sm:$0xff]  ;;  %v2064_v49 = vld [vmem:[%s2335_s5 + $0xf8] sm:$0xff] }
  0x28   :  { %2414 = vst [vmem:[#allocation51_spill] sm:$0xff] %v2059_v48  ;;  %2415 = vst [vmem:[#allocation52_spill] sm:$0xff] %v2064_v49 }
  0x29   :  { %336 = vsyncadd [#allocation7 + $0x4], 4096  ;;  %v2069_v50 = vld [vmem:[%s2330_s0] sm:$0xff]  ;;  %v1427_v51 = vcombine.high %v1659_v14, %v1664_v15  ;;  %v1426_v52 = vcombine.low %v1659_v14, %v1664_v15  ;;  %v1425_v48 = vcombine.high %v1649_v12, %v1654_v13 }
  0x2a   :  { %1539 = dma.done.wait [#allocation7], 4096 }
  0x2b   :  { %1540 = vsyncadd [#allocation7], 4294963200  ;;  %553 = vmatprep.subr.bf16.mxu0 %v1427_v51  ;;  %v1424_v49 = vcombine.low %v1649_v12, %v1654_v13  ;;  %v1423_v53 = vcombine.high %v1639_v10, %v1644_v11  ;;  %v1422_v54 = vcombine.low %v1639_v10, %v1644_v11  ;;  %v1421_v14 = vcombine.high %v1629_v8, %v1634_v9 }
  0x2c   :  { %554 = vmatpush1.bf16.msra.mxu0 %v1426_v52  ;;  %v1411_v15 = vcombine.high %v2069_v50, %v2069_v50  ;;  %v1420_v12 = vcombine.low %v1629_v8, %v1634_v9  ;;  %v1419_v13 = vcombine.high %v1619_v6, %v1624_v7  ;;  %v1418_v10 = vcombine.low %v1619_v6, %v1624_v7 }
  0x2d   :  { %555 = vmatprep.subr.bf16.mxu0 %v1425_v48  ;;  %v1417_v11 = vcombine.high %v1609_v4, %v1614_v5  ;;  %v1416_v48 = vcombine.low %v1609_v4, %v1614_v5  ;;  %v1415_v8 = vcombine.high %v1599_v2, %v1604_v3  ;;  %v1414_v9 = vcombine.low %v1599_v2, %v1604_v3 }
  0x2e   :  { %585 = vmatprep.mubr.bf16.mxu0 %v1411_v15  ;;  %v1413_v6 = vcombine.high %v1589_v0, %v1594_v1  ;;  %v1412_v7 = vcombine.low %v1589_v0, %v1594_v1  ;;  %v1443_v4 = vcombine.high %v1739_v30, %v1744_v31  ;;  %v1442_v5 = vcombine.low %v1739_v30, %v1744_v31 }
  0x2f   :  { %v1441_v2 = vcombine.high %v1729_v28, %v1734_v29  ;;  %v1440_v3 = vcombine.low %v1729_v28, %v1734_v29  ;;  %v1439_v0 = vcombine.high %v1719_v26, %v1724_v27  ;;  %v1438_v1 = vcombine.low %v1719_v26, %v1724_v27 }
  0x30   :  { %556 = vmatpush1.bf16.msra.mxu0 %v1424_v49  ;;  %v1437_v30 = vcombine.high %v1709_v24, %v1714_v25  ;;  %v1436_v31 = vcombine.low %v1709_v24, %v1714_v25  ;;  %v1435_v28 = vcombine.high %v1699_v22, %v1704_v23  ;;  %v1434_v29 = vcombine.low %v1699_v22, %v1704_v23 }
  0x31   :  { %557 = vmatprep.subr.bf16.mxu0 %v1423_v53  ;;  %v1433_v26 = vcombine.high %v1689_v20, %v1694_v21  ;;  %v1432_v27 = vcombine.low %v1689_v20, %v1694_v21  ;;  %v1431_v24 = vcombine.high %v1679_v18, %v1684_v19  ;;  %v1430_v25 = vcombine.low %v1679_v18, %v1684_v19  ;;  %v374_v18 = vld [vmem:[%s2332_s2] ss:$8 sm:$0x3] }
  0x32   :  { %v1429_v22 = vcombine.high %v1669_v16, %v1674_v17  ;;  %v1428_v23 = vcombine.low %v1669_v16, %v1674_v17  ;;  %v1410_v20 = vcombine.low %v2069_v50, %v2069_v50  ;;  %v376_v21 = vlaneseq }
  0x34   :  { %558 = vmatpush1.bf16.msra.mxu0 %v1422_v54  ;;  %v377_v49 = vshrl.u32 %v376_v21, 7 }
  0x35   :  { %559 = vmatprep.subr.bf16.mxu0 %v1421_v14 }
  0x36   :  { %v2139_v51 = vsub.s32 0, %v377_v49  ;;  %v2144_v19 = vsub.s32 1, %v377_v49 }
  0x38   :  { %560 = vmatpush1.bf16.msra.mxu0 %v1420_v12  ;;  %v379_v52 = vrot.slane %v374_v18, %v2139_v51  ;;  %v383_v16 = vrot.slane %v374_v18, %v2144_v19 }
  0x39   :  { %561 = vmatprep.subr.bf16.mxu0 %v1419_v13 }
  0x3c   :  { %562 = vmatpush1.bf16.msra.mxu0 %v1418_v10 }
  0x3d   :  { %563 = vmatprep.subr.bf16.mxu0 %v1417_v11 }
  0x40   :  { %564 = vmatpush1.bf16.msra.mxu0 %v1416_v48 }
  0x41   :  { %565 = vmatprep.subr.bf16.mxu0 %v1415_v8 }
  0x44   :  { %566 = vmatpush1.bf16.msra.mxu0 %v1414_v9 }
  0x45   :  { %567 = vmatprep.subr.bf16.mxu0 %v1413_v6 }
  0x48   :  { %568 = vmatpush1.bf16.msra.mxu0 %v1412_v7 }
  0x49   :  { %569 = vmatprep.subr.bf16.mxu0 %v1443_v4 }
  0x4c   :  { %570 = vmatpush2.bf16.msra.mxu0 %v1442_v5 }
  0x4d   :  { %571 = vmatprep.subr.bf16.mxu0 %v1441_v2 }
  0x50   :  { %572 = vmatpush2.bf16.msra.mxu0 %v1440_v3 }
  0x51   :  { %573 = vmatprep.subr.bf16.mxu0 %v1439_v0 }
  0x54   :  { %574 = vmatpush2.bf16.msra.mxu0 %v1438_v1 }
  0x55   :  { %575 = vmatprep.subr.bf16.mxu0 %v1437_v30 }
  0x58   :  { %576 = vmatpush2.bf16.msra.mxu0 %v1436_v31 }
  0x59   :  { %577 = vmatprep.subr.bf16.mxu0 %v1435_v28 }
  0x5c   :  { %578 = vmatpush2.bf16.msra.mxu0 %v1434_v29 }
  0x5d   :  { %579 = vmatprep.subr.bf16.mxu0 %v1433_v26 }
  0x60   :  { %580 = vmatpush2.bf16.msra.mxu0 %v1432_v27 }
  0x61   :  { %581 = vmatprep.subr.bf16.mxu0 %v1431_v24 }
  0x64   :  { %582 = vmatpush2.bf16.msra.mxu0 %v1430_v25 }
  0x65   :  { %583 = vmatprep.subr.bf16.mxu0 %v1429_v22 }
  0x68   :  { %584 = vmatpush2.bf16.msra.mxu0 %v1428_v23 }
  0x6b   :  { %586 = vmatmul.mubr.bf16.vlgmr.msra.gmra.mxu0 %v1410_v20 }
 0x12b   :  { %v587_v17 = vpop.f32.mrf.mxu0 }
 0x12c   :  { %v588_v53 = vadd.f32 %v587_v17, %v379_v52 }
 0x12d   :  { %v589_v54 = vpop.f32.mrf.mxu0 }
 0x12e   :  { %v594_v50 = vmax.f32 %v588_v53, 0.0  ;;  %v590_v14 = vadd.f32 %v589_v54, %v383_v16 }
 0x12f   :  { %v591_v15 = vpop.f32.mrf.mxu0 }
 0x130   :  { %v600_v12 = vrot.slane %v594_v50, 4  ;;  %v595_v13 = vmax.f32 %v590_v14, 0.0 }
 0x131   :  { %v592_v10 = vpop.f32.mrf.mxu0 }
 0x132   :  { %v601_v11 = vadd.f32 %v600_v12, %v594_v50  ;;  %v606_v48 = vrot.slane %v595_v13, 4  ;;  %v1545_v10 = vmov 1966171168  }
 0x134   :  { %v602_v8 = vrot.slane %v601_v11, 2  ;;  %v607_v9 = vadd.f32 %v606_v48, %v595_v13 }
 0x136   :  { %v603_v6 = vadd.f32 %v602_v8, %v601_v11  ;;  %v608_v7 = vrot.slane %v607_v9, 2  ;;  %v641_v11 = vunpack.c.l.s4 %v1545_v10 }
 0x138   :  { %v604_v4 = vrot.slane %v603_v6, 1  ;;  %v609_v5 = vadd.f32 %v608_v7, %v607_v9  ;;  %v642_v48 = vunpack.c.0.s8 %v641_v11 }
 0x13a   :  { %v605_v2 = vadd.f32 %v604_v4, %v603_v6  ;;  %v610_v3 = vrot.slane %v609_v5, 1  ;;  %v2148_v9 = vsub.s32 %v642_v48, %v377_v49 }
 0x13c   :  { %v613_v0 = vmul.f32 0.125, %v605_v2  ;;  %v611_v1 = vadd.f32 %v610_v3, %v609_v5  ;;  %v1444_v5 = vld [vmem:[%s2332_s2 + $0x1] ss:$8 sm:$0x3] }
 0x13e   :  { %v615_v30 = vsub.f32 %v594_v50, %v613_v0  ;;  %v614_v31 = vmul.f32 0.125, %v611_v1 }
 0x140   :  { %v617_v28 = vmul.f32 %v615_v30, %v615_v30  ;;  %v616_v29 = vsub.f32 %v595_v13, %v614_v31 }
 0x142   :  { %v619_v26 = vrot.slane %v617_v28, 4  ;;  %v618_v27 = vmul.f32 %v616_v29, %v616_v29 }
 0x144   :  { %v620_v24 = vadd.f32 %v619_v26, %v617_v28  ;;  %v625_v25 = vrot.slane %v618_v27, 4 }
 0x146   :  { %v621_v22 = vrot.slane %v620_v24, 2  ;;  %v626_v23 = vadd.f32 %v625_v25, %v618_v27  ;;  %v1445_v27 = vld [vmem:[%s2332_s2 + $0x2] ss:$8 sm:$0x3] }
 0x148   :  { %v622_v20 = vadd.f32 %v621_v22, %v620_v24  ;;  %v627_v21 = vrot.slane %v626_v23, 2 }
 0x14a   :  { %v623_v18 = vrot.slane %v622_v20, 1  ;;  %v628_v52 = vadd.f32 %v627_v21, %v626_v23 }
 0x14c   :  { %v624_v16 = vadd.f32 %v623_v18, %v622_v20  ;;  %v629_v17 = vrot.slane %v628_v52, 1 }
 0x14e   :  { %v631_v53 = vmul.f32 0.125, %v624_v16  ;;  %v630_v54 = vadd.f32 %v629_v17, %v628_v52  ;;  %v1463_v52 = vcombine.low %v1819_v46, %v1824_v47  ;;  %v1462_v16 = vcombine.high %v1809_v44, %v1814_v45 }
 0x150   :  { %v633_v14 = vadd.f32 1e-05, %v631_v53  ;;  %v632_v15 = vmul.f32 0.125, %v630_v54 }
 0x152   :  { %v634_v12 = vadd.f32 1e-05, %v632_v15  ;;  %1531 = vrsqrt.f32 %v633_v14 }
 0x154   :  { %1533 = vrsqrt.f32 %v634_v12 }
 0x15f   :  { %v1532_v8 = vpop.eup %1531 }
 0x161   :  { %v1534_v6 = vpop.eup %1533 }
 0x162   :  { %v639_v7 = vcombine.low %v1532_v8, %v1534_v6 }
 0x164   :  { %v646_v4 = vrot.slane %v639_v7, %v2148_v9 }
 0x166   :  { %v653_v2 = vrot.slane %v646_v4, %v2148_v9 }
 0x168   :  { %v655_v3 = vmul.f32 %v1444_v5, %v653_v2 }
 0x16a   :  { %v660_v1 = vrot.slane %v655_v3, %v2139_v51  ;;  %v664_v30 = vrot.slane %v655_v3, %v2144_v19 }
 0x16c   :  { %v667_v28 = vmul.f32 %v660_v1, %v613_v0  ;;  %v668_v29 = vmul.f32 %v664_v30, %v614_v31  ;;  %v688_v22 = vmul.f32 %v660_v1, %v594_v50  ;;  %v689_v23 = vmul.f32 %v664_v30, %v595_v13 }
 0x16d   :  { %v1464_v31 = vcombine.high %v1819_v46, %v1824_v47 }
 0x16e   :  { %v671_v26 = vcombine.low %v667_v28, %v668_v29 }
 0x170   :  { %v678_v49 = vrot.slane %v671_v26, %v2148_v9 }
 0x172   :  { %v685_v24 = vrot.slane %v678_v49, %v2148_v9 }
 0x174   :  { %v687_v25 = vsub.f32 %v1445_v27, %v685_v24 }
 0x176   :  { %v694_v20 = vrot.slane %v687_v25, %v2139_v51  ;;  %v698_v21 = vrot.slane %v687_v25, %v2144_v19 }
 0x178   :  { %v2164_v18 = vadd.f32 %v694_v20, %v688_v22  ;;  %v702_v0 = vadd.f32 %v698_v21, %v689_v23 }
 0x179   :  { %1541 = dma.done.wait [#allocation7 + $0x2], 4096 }
 0x17a   :  { %1542 = vsyncadd [#allocation7 + $0x2], 4294963200  ;;  %926 = vmatprep.subr.bf16.mxu1 %v1464_v31  ;;  %v1461_v50 = vcombine.low %v1809_v44, %v1814_v45  ;;  %v1460_v13 = vcombine.high %v1799_v42, %v1804_v43  ;;  %v1459_v17 = vcombine.low %v1799_v42, %v1804_v43  ;;  %v1458_v46 = vcombine.high %v1789_v40, %v1794_v41  ;;  %v2416_v54 = vld [vmem:[#allocation20_spill] sm:$0xff]  ;;  %v2417_v14 = vld [vmem:[#allocation19_spill] sm:$0xff] }
 0x17b   :  { %927 = vmatpush1.bf16.msra.mxu1 %v1463_v52  ;;  %v1527_v47 = vpack.c.bf16 %v702_v0, %v702_v0  ;;  %v1457_v53 = vcombine.low %v1789_v40, %v1794_v41  ;;  %v1456_v44 = vcombine.high %v1779_v38, %v1784_v39  ;;  %v1455_v45 = vcombine.low %v1779_v38, %v1784_v39  ;;  %v2418_v15 = vld [vmem:[#allocation18_spill] sm:$0xff]  ;;  %v2419_v12 = vld [vmem:[#allocation17_spill] sm:$0xff]  ;;  %v2420_v10 = vld [vmem:[#allocation16_spill] sm:$0xff] }
 0x17c   :  { %928 = vmatprep.subr.bf16.mxu1 %v1462_v16  ;;  %v1454_v42 = vcombine.high %v1769_v36, %v1774_v37  ;;  %v1453_v43 = vcombine.low %v1769_v36, %v1774_v37  ;;  %v1452_v40 = vcombine.high %v1759_v34, %v1764_v35  ;;  %v1451_v41 = vcombine.low %v1759_v34, %v1764_v35  ;;  %v2421_v11 = vld [vmem:[#allocation15_spill] sm:$0xff]  ;;  %v2422_v48 = vld [vmem:[#allocation14_spill] sm:$0xff] }
 0x17d   :  { %958 = vmatprep.mubr.bf16.mxu1 %v1527_v47  ;;  %v1450_v38 = vcombine.high %v1749_v32, %v1754_v33  ;;  %v1449_v39 = vcombine.low %v1749_v32, %v1754_v33  ;;  %v1480_v36 = vcombine.high %v1899_v62, %v1904_v63  ;;  %v1479_v37 = vcombine.low %v1899_v62, %v1904_v63  ;;  %v747_v7 = vld [vmem:[%s2334_s4] ss:$8 sm:$0x3] }
 0x17e   :  { %v1478_v34 = vcombine.high %v1889_v60, %v1894_v61  ;;  %v1477_v35 = vcombine.low %v1889_v60, %v1894_v61  ;;  %v1476_v32 = vcombine.high %v1879_v58, %v1884_v59  ;;  %v1475_v33 = vcombine.low %v1879_v58, %v1884_v59 }
 0x17f   :  { %929 = vmatpush1.bf16.msra.mxu1 %v1461_v50  ;;  %v1474_v62 = vcombine.high %v1869_v56, %v1874_v57  ;;  %v1473_v63 = vcombine.low %v1869_v56, %v1874_v57  ;;  %v1472_v60 = vcombine.high %v2416_v54, %v1864_v55  ;;  %v1471_v61 = vcombine.low %v2416_v54, %v1864_v55 }
 0x180   :  { %930 = vmatprep.subr.bf16.mxu1 %v1460_v13  ;;  %v1470_v58 = vcombine.high %v2418_v15, %v2417_v14  ;;  %v1469_v59 = vcombine.low %v2418_v15, %v2417_v14  ;;  %v1468_v56 = vcombine.high %v2420_v10, %v2419_v12  ;;  %v1467_v57 = vcombine.low %v2420_v10, %v2419_v12  ;;  %v1481_v15 = vld [vmem:[%s2334_s4 + $0x1] ss:$8 sm:$0x3] }
 0x181   :  { %v1466_v55 = vcombine.high %v2422_v48, %v2421_v11  ;;  %v1465_v8 = vcombine.low %v2422_v48, %v2421_v11  ;;  %v1526_v6 = vpack.c.bf16 %v2164_v18, %v2164_v18  ;;  %v752_v4 = vrot.slane %v747_v7, %v2139_v51 }
 0x182   :  { %v756_v5 = vrot.slane %v747_v7, %v2144_v19 }
 0x183   :  { %931 = vmatpush1.bf16.msra.mxu1 %v1459_v17 }
 0x184   :  { %932 = vmatprep.subr.bf16.mxu1 %v1458_v46 }
 0x187   :  { %933 = vmatpush1.bf16.msra.mxu1 %v1457_v53 }
 0x188   :  { %934 = vmatprep.subr.bf16.mxu1 %v1456_v44 }
 0x18b   :  { %935 = vmatpush1.bf16.msra.mxu1 %v1455_v45 }
 0x18c   :  { %936 = vmatprep.subr.bf16.mxu1 %v1454_v42 }
 0x18f   :  { %937 = vmatpush1.bf16.msra.mxu1 %v1453_v43 }
 0x190   :  { %938 = vmatprep.subr.bf16.mxu1 %v1452_v40 }
 0x193   :  { %939 = vmatpush1.bf16.msra.mxu1 %v1451_v41 }
 0x194   :  { %940 = vmatprep.subr.bf16.mxu1 %v1450_v38 }
 0x197   :  { %941 = vmatpush1.bf16.msra.mxu1 %v1449_v39 }
 0x198   :  { %942 = vmatprep.subr.bf16.mxu1 %v1480_v36 }
 0x19b   :  { %943 = vmatpush2.bf16.msra.mxu1 %v1479_v37 }
 0x19c   :  { %944 = vmatprep.subr.bf16.mxu1 %v1478_v34 }
 0x19f   :  { %945 = vmatpush2.bf16.msra.mxu1 %v1477_v35 }
 0x1a0   :  { %946 = vmatprep.subr.bf16.mxu1 %v1476_v32 }
 0x1a3   :  { %947 = vmatpush2.bf16.msra.mxu1 %v1475_v33 }
 0x1a4   :  { %948 = vmatprep.subr.bf16.mxu1 %v1474_v62 }
 0x1a7   :  { %949 = vmatpush2.bf16.msra.mxu1 %v1473_v63 }
 0x1a8   :  { %950 = vmatprep.subr.bf16.mxu1 %v1472_v60 }
 0x1ab   :  { %951 = vmatpush2.bf16.msra.mxu1 %v1471_v61 }
 0x1ac   :  { %952 = vmatprep.subr.bf16.mxu1 %v1470_v58 }
 0x1af   :  { %953 = vmatpush2.bf16.msra.mxu1 %v1469_v59 }
 0x1b0   :  { %954 = vmatprep.subr.bf16.mxu1 %v1468_v56 }
 0x1b3   :  { %955 = vmatpush2.bf16.msra.mxu1 %v1467_v57 }
 0x1b4   :  { %956 = vmatprep.subr.bf16.mxu1 %v1466_v55  ;;  %v1482_v55 = vld [vmem:[%s2334_s4 + $0x2] ss:$8 sm:$0x3] }
 0x1b7   :  { %957 = vmatpush2.bf16.msra.mxu1 %v1465_v8 }
 0x1ba   :  { %959 = vmatmul.mubr.bf16.vlgmr.msra.gmra.mxu1 %v1526_v6 }
 0x27a   :  { %v960_v2 = vpop.f32.mrf.mxu1 }
 0x27b   :  { %v961_v3 = vadd.f32 %v960_v2, %v752_v4 }
 0x27c   :  { %v962_v1 = vpop.f32.mrf.mxu1 }
 0x27d   :  { %v967_v30 = vmax.f32 %v961_v3, 0.0  ;;  %v963_v28 = vadd.f32 %v962_v1, %v756_v5 }
 0x27e   :  { %v964_v29 = vpop.f32.mrf.mxu1 }
 0x27f   :  { %v973_v26 = vrot.slane %v967_v30, 4  ;;  %v968_v49 = vmax.f32 %v963_v28, 0.0  ;;  %v2423_v28 = vld [vmem:[#allocation36_spill] sm:$0xff]  ;;  %v2424_v29 = vld [vmem:[#allocation35_spill] sm:$0xff] }
 0x280   :  { %v965_v27 = vpop.f32.mrf.mxu1 }
 0x281   :  { %v974_v24 = vadd.f32 %v973_v26, %v967_v30  ;;  %v979_v25 = vrot.slane %v968_v49, 4  ;;  %v1501_v26 = vcombine.high %v2424_v29, %v2423_v28  ;;  %v1500_v27 = vcombine.low %v2424_v29, %v2423_v28 }
 0x283   :  { %v975_v22 = vrot.slane %v974_v24, 2  ;;  %v980_v23 = vadd.f32 %v979_v25, %v968_v49  ;;  %v2426_v25 = vld [vmem:[#allocation33_spill] sm:$0xff] }
 0x285   :  { %v976_v20 = vadd.f32 %v975_v22, %v974_v24  ;;  %v981_v21 = vrot.slane %v980_v23, 2  ;;  %v2425_v24 = vld [vmem:[#allocation34_spill] sm:$0xff] }
 0x286   :  { %v1499_v22 = vcombine.high %v2426_v25, %v2425_v24 }
 0x287   :  { %v977_v18 = vrot.slane %v976_v20, 1  ;;  %v982_v0 = vadd.f32 %v981_v21, %v980_v23 }
 0x289   :  { %v978_v31 = vadd.f32 %v977_v18, %v976_v20  ;;  %v983_v52 = vrot.slane %v982_v0, 1 }
 0x28b   :  { %v985_v16 = vmul.f32 0.125, %v978_v31  ;;  %v984_v50 = vadd.f32 %v983_v52, %v982_v0 }
 0x28d   :  { %v987_v13 = vsub.f32 %v967_v30, %v985_v16  ;;  %v986_v17 = vmul.f32 0.125, %v984_v50 }
 0x28f   :  { %v989_v46 = vmul.f32 %v987_v13, %v987_v13  ;;  %v988_v47 = vsub.f32 %v968_v49, %v986_v17 }
 0x291   :  { %v991_v53 = vrot.slane %v989_v46, 4  ;;  %v990_v44 = vmul.f32 %v988_v47, %v988_v47 }
 0x293   :  { %v992_v45 = vadd.f32 %v991_v53, %v989_v46  ;;  %v997_v42 = vrot.slane %v990_v44, 4 }
 0x295   :  { %v993_v43 = vrot.slane %v992_v45, 2  ;;  %v998_v40 = vadd.f32 %v997_v42, %v990_v44 }
 0x297   :  { %v994_v41 = vadd.f32 %v993_v43, %v992_v45  ;;  %v999_v38 = vrot.slane %v998_v40, 2 }
 0x299   :  { %v995_v39 = vrot.slane %v994_v41, 1  ;;  %v1000_v36 = vadd.f32 %v999_v38, %v998_v40 }
 0x29b   :  { %v996_v37 = vadd.f32 %v995_v39, %v994_v41  ;;  %v1001_v34 = vrot.slane %v1000_v36, 1 }
 0x29d   :  { %v1003_v35 = vmul.f32 0.125, %v996_v37  ;;  %v1002_v32 = vadd.f32 %v1001_v34, %v1000_v36 }
 0x29f   :  { %v1005_v33 = vadd.f32 1e-05, %v1003_v35  ;;  %v1004_v62 = vmul.f32 0.125, %v1002_v32 }
 0x2a1   :  { %v1006_v63 = vadd.f32 1e-05, %v1004_v62  ;;  %1535 = vrsqrt.f32 %v1005_v33 }
 0x2a3   :  { %1537 = vrsqrt.f32 %v1006_v63 }
 0x2ae   :  { %v1536_v54 = vpop.eup %1535 }
 0x2b0   :  { %v1538_v60 = vpop.eup %1537 }
 0x2b1   :  { %v1011_v61 = vcombine.low %v1536_v54, %v1538_v60 }
 0x2b3   :  { %v1018_v14 = vrot.slane %v1011_v61, %v2148_v9 }
 0x2b5   :  { %v1025_v58 = vrot.slane %v1018_v14, %v2148_v9 }
 0x2b7   :  { %v1027_v59 = vmul.f32 %v1481_v15, %v1025_v58 }
 0x2b9   :  { %v1032_v12 = vrot.slane %v1027_v59, %v2139_v51  ;;  %v1036_v10 = vrot.slane %v1027_v59, %v2144_v19 }
 0x2bb   :  { %v1039_v56 = vmul.f32 %v1032_v12, %v985_v16  ;;  %v1040_v57 = vmul.f32 %v1036_v10, %v986_v17  ;;  %v1060_v7 = vmul.f32 %v1032_v12, %v967_v30  ;;  %v1061_v4 = vmul.f32 %v1036_v10, %v968_v49 }
 0x2bd   :  { %v1043_v11 = vcombine.low %v1039_v56, %v1040_v57 }
 0x2bf   :  { %v1050_v48 = vrot.slane %v1043_v11, %v2148_v9 }
 0x2c1   :  { %v1057_v8 = vrot.slane %v1050_v48, %v2148_v9 }
 0x2c3   :  { %v1059_v6 = vsub.f32 %v1482_v55, %v1057_v8 }
 0x2c5   :  { %v1066_v5 = vrot.slane %v1059_v6, %v2139_v51  ;;  %v1070_v2 = vrot.slane %v1059_v6, %v2144_v19 }
 0x2c7   :  { %v2251_v3 = vadd.f32 %v1066_v5, %v1060_v7  ;;  %v1074_v1 = vadd.f32 %v1070_v2, %v1061_v4 }
 0x2c8   :  { %1543 = dma.done.wait [#allocation7 + $0x4], 4096 }
 0x2c9   :  { %1544 = vsyncadd [#allocation7 + $0x4], 4294963200  ;;  %1298 = vmatprep.subr.bf16.mxu0 %v1501_v26  ;;  %v1498_v9 = vcombine.low %v2426_v25, %v2425_v24  ;;  %v2427_v30 = vld [vmem:[#allocation32_spill] sm:$0xff]  ;;  %v2428_v49 = vld [vmem:[#allocation31_spill] sm:$0xff]  ;;  %v1529_v31 = vpack.c.bf16 %v1074_v1, %v1074_v1  ;;  %v1528_v24 = vpack.c.bf16 %v2251_v3, %v2251_v3 }
 0x2ca   :  { %1299 = vmatpush1.bf16.msra.mxu0 %v1500_v27  ;;  %v1497_v23 = vcombine.high %v2428_v49, %v2427_v30  ;;  %v1496_v20 = vcombine.low %v2428_v49, %v2427_v30  ;;  %v2429_v21 = vld [vmem:[#allocation30_spill] sm:$0xff]  ;;  %v2430_v18 = vld [vmem:[#allocation29_spill] sm:$0xff]  ;;  %v2431_v16 = vld [vmem:[#allocation28_spill] sm:$0xff] }
 0x2cb   :  { %1300 = vmatprep.subr.bf16.mxu0 %v1499_v22  ;;  %v1495_v0 = vcombine.high %v2430_v18, %v2429_v21  ;;  %1330 = vmatprep.mubr.bf16.mxu0 %v1529_v31  ;;  %v1494_v52 = vcombine.low %v2430_v18, %v2429_v21  ;;  %v2432_v50 = vld [vmem:[#allocation27_spill] sm:$0xff]  ;;  %v2433_v46 = vld [vmem:[#allocation26_spill] sm:$0xff]  ;;  %v2434_v47 = vld [vmem:[#allocation25_spill] sm:$0xff] }
 0x2cc   :  { %v1493_v13 = vcombine.high %v2432_v50, %v2431_v16  ;;  %v1492_v17 = vcombine.low %v2432_v50, %v2431_v16  ;;  %v1491_v53 = vcombine.high %v2434_v47, %v2433_v46  ;;  %v1490_v44 = vcombine.low %v2434_v47, %v2433_v46  ;;  %v2435_v45 = vld [vmem:[#allocation24_spill] sm:$0xff]  ;;  %v2436_v42 = vld [vmem:[#allocation23_spill] sm:$0xff]  ;;  %v2437_v41 = vld [vmem:[#allocation22_spill] sm:$0xff] }
 0x2cd   :  { %v1489_v43 = vcombine.high %v2436_v42, %v2435_v45  ;;  %v1488_v40 = vcombine.low %v2436_v42, %v2435_v45  ;;  %v2438_v38 = vld [vmem:[#allocation21_spill] sm:$0xff]  ;;  %v2439_v37 = vld [vmem:[#allocation52_spill] sm:$0xff]  ;;  %v2440_v34 = vld [vmem:[#allocation51_spill] sm:$0xff] }
 0x2ce   :  { %1301 = vmatpush1.bf16.msra.mxu0 %v1498_v9  ;;  %v1487_v39 = vcombine.high %v2438_v38, %v2437_v41  ;;  %v1486_v36 = vcombine.low %v2438_v38, %v2437_v41  ;;  %v1517_v35 = vcombine.high %v2440_v34, %v2439_v37  ;;  %v1516_v32 = vcombine.low %v2440_v34, %v2439_v37  ;;  %v2441_v33 = vld [vmem:[#allocation50_spill] sm:$0xff]  ;;  %v2442_v62 = vld [vmem:[#allocation49_spill] sm:$0xff]  ;;  %v2443_v60 = vld [vmem:[#allocation48_spill] sm:$0xff] }
 0x2cf   :  { %1302 = vmatprep.subr.bf16.mxu0 %v1497_v23  ;;  %v1515_v63 = vcombine.high %v2442_v62, %v2441_v33  ;;  %v1514_v54 = vcombine.low %v2442_v62, %v2441_v33  ;;  %v2444_v61 = vld [vmem:[#allocation47_spill] sm:$0xff]  ;;  %v2445_v58 = vld [vmem:[#allocation46_spill] sm:$0xff]  ;;  %v2446_v59 = vld [vmem:[#allocation45_spill] sm:$0xff] }
 0x2d0   :  { %v1513_v14 = vcombine.high %v2444_v61, %v2443_v60  ;;  %v1512_v15 = vcombine.low %v2444_v61, %v2443_v60  ;;  %v1511_v12 = vcombine.high %v2446_v59, %v2445_v58  ;;  %v1510_v10 = vcombine.low %v2446_v59, %v2445_v58  ;;  %v2447_v56 = vld [vmem:[#allocation44_spill] sm:$0xff]  ;;  %v2448_v57 = vld [vmem:[#allocation43_spill] sm:$0xff]  ;;  %v2449_v55 = vld [vmem:[#allocation42_spill] sm:$0xff] }
 0x2d1   :  { %v1509_v11 = vcombine.high %v2448_v57, %v2447_v56  ;;  %v1508_v48 = vcombine.low %v2448_v57, %v2447_v56  ;;  %v2450_v8 = vld [vmem:[#allocation41_spill] sm:$0xff]  ;;  %v2451_v4 = vld [vmem:[#allocation40_spill] sm:$0xff]  ;;  %v2452_v5 = vld [vmem:[#allocation39_spill] sm:$0xff] }
 0x2d2   :  { %1303 = vmatpush1.bf16.msra.mxu0 %v1496_v20  ;;  %v1507_v6 = vcombine.high %v2450_v8, %v2449_v55  ;;  %v1506_v7 = vcombine.low %v2450_v8, %v2449_v55  ;;  %v1505_v2 = vcombine.high %v2452_v5, %v2451_v4  ;;  %v1504_v1 = vcombine.low %v2452_v5, %v2451_v4  ;;  %v2453_v28 = vld [vmem:[#allocation38_spill] sm:$0xff]  ;;  %v2454_v29 = vld [vmem:[#allocation37_spill] sm:$0xff] }
 0x2d3   :  { %1304 = vmatprep.subr.bf16.mxu0 %v1495_v0  ;;  %v1503_v26 = vcombine.high %v2454_v29, %v2453_v28  ;;  %v1502_v27 = vcombine.low %v2454_v29, %v2453_v28  ;;  %v1119_v25 = vld [vmem:[%s2336_s6] ss:$8 sm:$0x3] }
 0x2d4   :  { %v1124_v22 = vrot.slane %v1119_v25, %v2139_v51  ;;  %v1128_v9 = vrot.slane %v1119_v25, %v2144_v19 }
 0x2d6   :  { %1305 = vmatpush1.bf16.msra.mxu0 %v1494_v52 }
 0x2d7   :  { %1306 = vmatprep.subr.bf16.mxu0 %v1493_v13 }
 0x2da   :  { %1307 = vmatpush1.bf16.msra.mxu0 %v1492_v17 }
 0x2db   :  { %1308 = vmatprep.subr.bf16.mxu0 %v1491_v53 }
 0x2de   :  { %1309 = vmatpush1.bf16.msra.mxu0 %v1490_v44 }
 0x2df   :  { %1310 = vmatprep.subr.bf16.mxu0 %v1489_v43 }
 0x2e2   :  { %1311 = vmatpush1.bf16.msra.mxu0 %v1488_v40 }
 0x2e3   :  { %1312 = vmatprep.subr.bf16.mxu0 %v1487_v39 }
 0x2e6   :  { %1313 = vmatpush1.bf16.msra.mxu0 %v1486_v36 }
 0x2e7   :  { %1314 = vmatprep.subr.bf16.mxu0 %v1517_v35 }
 0x2ea   :  { %1315 = vmatpush2.bf16.msra.mxu0 %v1516_v32 }
 0x2eb   :  { %1316 = vmatprep.subr.bf16.mxu0 %v1515_v63 }
 0x2ee   :  { %1317 = vmatpush2.bf16.msra.mxu0 %v1514_v54 }
 0x2ef   :  { %1318 = vmatprep.subr.bf16.mxu0 %v1513_v14 }
 0x2f2   :  { %1319 = vmatpush2.bf16.msra.mxu0 %v1512_v15 }
 0x2f3   :  { %1320 = vmatprep.subr.bf16.mxu0 %v1511_v12 }
 0x2f6   :  { %1321 = vmatpush2.bf16.msra.mxu0 %v1510_v10 }
 0x2f7   :  { %1322 = vmatprep.subr.bf16.mxu0 %v1509_v11 }
 0x2fa   :  { %1323 = vmatpush2.bf16.msra.mxu0 %v1508_v48 }
 0x2fb   :  { %1324 = vmatprep.subr.bf16.mxu0 %v1507_v6 }
 0x2fe   :  { %1325 = vmatpush2.bf16.msra.mxu0 %v1506_v7 }
 0x2ff   :  { %1326 = vmatprep.subr.bf16.mxu0 %v1505_v2 }
 0x302   :  { %1327 = vmatpush2.bf16.msra.mxu0 %v1504_v1 }
 0x303   :  { %1328 = vmatprep.subr.bf16.mxu0 %v1503_v26 }
 0x306   :  { %1329 = vmatpush2.bf16.msra.mxu0 %v1502_v27 }
 0x309   :  { %1331 = vmatmul.mubr.bf16.vlgmr.msra.gmra.mxu0 %v1528_v24 }
 0x3c9   :  { %v1332_v30 = vpop.f32.mrf.mxu0 }
 0x3ca   :  { %v1333_v49 = vadd.f32 %v1332_v30, %v1124_v22 }
 0x3cb   :  { %v1334_v23 = vpop.f32.mrf.mxu0 }
 0x3cc   :  { %1339 = vst [vmem:[%s2337_s7] sm:$0xff] %v1333_v49  ;;  %v1335_v20 = vadd.f32 %v1334_v23, %v1128_v9 }
 0x3cd   :  { %v1336_v21 = vpop.f32.mrf.mxu0 }
 0x3ce   :  { %1340 = vst [vmem:[%s2337_s7 + $0x8] sm:$0xff] %v1335_v20 }
 0x3cf   :  { %v1337_v3 = vpop.f32.mrf.mxu0 }
 0x3d0   :  { %1345 = vsyncmov [#allocation7] }
 0x3d3   :  { %s1346_s6 = vpop.sfrf %1345 }
 0x3d4   :  { %p1518_p0 = scmp.ne.s32.totalorder %s1346_s6, 0 }
 0x3d6   :  { %1350 = shalt.err (%p1518_p0)  }
 0x3d7   :  { %1352 = vsyncmov [#allocation7 + $0x1] }
 0x3da   :  { %s1353_s16 = vpop.sfrf %1352 }
 0x3db   :  { %p1519_p1 = scmp.ne.s32.totalorder %s1353_s16, 0 }
 0x3dd   :  { %1357 = shalt.err (%p1519_p1)  }
 0x3de   :  { %1359 = vsyncmov [#allocation7 + $0x2] }
 0x3e1   :  { %s1360_s17 = vpop.sfrf %1359 }
 0x3e2   :  { %p1520_p2 = scmp.ne.s32.totalorder %s1360_s17, 0 }
 0x3e4   :  { %1364 = shalt.err (%p1520_p2)  }
 0x3e5   :  { %1366 = vsyncmov [#allocation7 + $0x3] }
 0x3e8   :  { %s1367_s18 = vpop.sfrf %1366 }
 0x3e9   :  { %p1521_p3 = scmp.ne.s32.totalorder %s1367_s18, 0 }
 0x3eb   :  { %1371 = shalt.err (%p1521_p3)  }
 0x3ec   :  { %1373 = vsyncmov [#allocation7 + $0x4] }
 0x3ef   :  { %s1374_s3 = vpop.sfrf %1373 }
 0x3f0   :  { %p1522_p4 = scmp.ne.s32.totalorder %s1374_s3, 0 }
 0x3f2   :  { %1378 = shalt.err (%p1522_p4)  }
 0x3f3   :  { %1380 = vsyncmov [#allocation7 + $0x5] }
 0x3f6   :  { %s1381_s7 = vpop.sfrf %1380 }
 0x3f7   :  { %p1523_p5 = scmp.ne.s32.totalorder %s1381_s7, 0 }
 0x3f9   :  { %1385 = shalt.err (%p1523_p5)  }

</bundles_post_ra>
